<compile_context>
chip_gen: v6e
topology: v6e:2x2x1
jax: 0.10.0
libtpu: 0.0.40
codegen_flags: <defaults>
</compile_context>

<pallas_src>
import math
from functools import partial

import numpy as np
import jax
import jax.numpy as jnp
from jax.experimental import pallas as pl
from jax.experimental.pallas import tpu as pltpu

LN_EPS = 1e-5  # PyTorch nn.LayerNorm default


def _layer_norm(x, w, b):
    mu = jnp.mean(x, axis=-1, keepdims=True)
    var = jnp.mean((x - mu) ** 2, axis=-1, keepdims=True)
    return (x - mu) * jax.lax.rsqrt(var + LN_EPS) * w + b


# --------------------- stage 1: patch embedding kernel ---------------------
def patch_embed_kernel(patches_ref, pw_ref, posb_ref, out_ref):
    p = patches_ref[0].astype(jnp.bfloat16)                       # (N, P)
    out_ref[0] = (jnp.dot(p, pw_ref[...],
                          preferred_element_type=jnp.float32)
                  + posb_ref[...])                                # + pos + bias (f32)


# --------------------- stage 2: fused encoder kernel -----------------------
def encoder_kernel(tok_ref, ln_ref, qkvw_ref, projw_ref, projb_ref,
                   fc1w_ref, fc1b_ref, fc2w_ref, fc2b_ref, fln_ref,
                   out_ref, x_scr, *, TB, N, E, H):
    d = pl.program_id(1)
    hd = E // H
    Mt = TB * N
    bf16 = jnp.bfloat16

    # first depth step of this batch tile: load tokens into the VMEM carry
    @pl.when(d == 0)
    def _():
        x_scr[...] = tok_ref[...].reshape(Mt, E)

    x = x_scr[...]                                                # (Mt, E) f32

    # ---------------- multi-head self-attention (pre-norm) ----------------
    h = _layer_norm(x, ln_ref[0, 0], ln_ref[0, 1]).astype(bf16)
    # single full-width QKV matmul; softmax scale pre-folded into Q columns.
    qkv = jnp.dot(h, qkvw_ref[0],
                  preferred_element_type=jnp.float32).astype(bf16)  # (Mt, 3E)

    # head-major relayout with a lane-split reshape + one einshape
    # (no per-head lane slices / concats, no broadcast of weights):
    #   (Mt, 3H, hd) -> (3H, Mt, hd) -> (3H*TB, N, hd)
    qkv_h = pltpu.einshape("mgd->gmd", qkv.reshape(Mt, 3 * H, hd))
    qkv_h = qkv_h.reshape(3 * H * TB, N, hd)
    HB = H * TB
    q, k, v = qkv_h[:HB], qkv_h[HB:2 * HB], qkv_h[2 * HB:]

    s = jax.lax.dot_general(q, k, (((2,), (2,)), ((0,), (0,))),
                            preferred_element_type=jnp.float32)   # (HB, N, N)
    s = s - jnp.max(s, axis=-1, keepdims=True)
    e = jnp.exp(s)
    p = (e / jnp.sum(e, axis=-1, keepdims=True)).astype(bf16)     # probs in bf16
    o = jax.lax.dot_general(p, v, (((2,), (1,)), ((0,), (0,))),
                            preferred_element_type=jnp.float32)   # (HB, N, hd)

    # merge heads back to a lane-contiguous (Mt, E) slab; ONE flat projection
    # matmul with K = E (full MXU depth), no per-head weight broadcast.
    o = pltpu.einshape("hmd->mhd",
                       o.astype(bf16).reshape(H, Mt, hd)).reshape(Mt, E)
    attn = jnp.dot(o, projw_ref[0],
                   preferred_element_type=jnp.float32) + projb_ref[0, 0]
    x = x + attn

    # --------------------------- MLP (pre-norm) ----------------------------
    h2 = _layer_norm(x, ln_ref[0, 2], ln_ref[0, 3]).astype(bf16)
    m = jnp.dot(h2, fc1w_ref[0],
                preferred_element_type=jnp.float32) + fc1b_ref[0, 0]
    # TODO(synk): PyTorch nn.GELU defaults to exact erf-GELU; tanh approximation
    # is used here for a Mosaic-supported in-kernel lowering.
    m = jax.nn.gelu(m, approximate=True).astype(bf16)
    x = x + jnp.dot(m, fc2w_ref[0],
                    preferred_element_type=jnp.float32) + fc2b_ref[0, 0]

    x_scr[...] = x                                                # carry to next layer

    # final LayerNorm fused into the last depth step (head = Identity)
    @pl.when(d == pl.num_programs(1) - 1)
    def _():
        out_ref[...] = _layer_norm(x, fln_ref[0], fln_ref[1]).reshape(TB, N, E)


def _vmem_limit_bytes(E, Hm, N, H, TB):
    """Scoped-VMEM request: double-buffered bf16 weights + scratch + intermediates."""
    Mt = TB * N
    w_layer = 2 * (E * 3 * E + E * E + 2 * E * Hm) + 4 * (4 * E + 3 * E + Hm)
    acts = 4 * (6 * Mt * E + 2 * H * Mt * N + 2 * Mt * Hm) \
        + 2 * (4 * Mt * E + Mt * Hm + H * Mt * N)
    io = 4 * 4 * Mt * E                       # token / output blocks, double buffered
    return int(min(112 * 2 ** 20, 2 * w_layer + acts + io + (4 << 20)))


def vit_encoder_forward(x, params, cfg):
    """NCHW image -> (B, num_patches, embed_dim) tokens."""
    B = x.shape[0]
    psz, E, H = cfg["patch_size"], cfg["embed_dim"], cfg["num_heads"]
    depth = params["qkv_w"].shape[0]
    Hm = params["fc1_w"].shape[-1]
    TB = cfg.get("batch_tile", 1)
    assert B % TB == 0 and E % H == 0

    patches = extract_patches(x, psz)                             # (B, N, P)
    _, N, P = patches.shape
    posb = params["pos_embed"] + params["patch_b"]                # (N, E), not tiled by B

    # ---- stage 1: patch embed (kept out of the encoder's resident set) ----
    tokens = pl.pallas_call(
        patch_embed_kernel,
        out_shape=jax.ShapeDtypeStruct((B, N, E), jnp.float32),
        grid=(B,),
        in_specs=[pl.BlockSpec((1, N, P), lambda b: (b, 0, 0)),
                  pl.BlockSpec((P, E), lambda b: (0, 0)),
                  pl.BlockSpec((N, E), lambda b: (0, 0))],
        out_specs=pl.BlockSpec((1, N, E), lambda b: (b, 0, 0)),
        compiler_params=pltpu.CompilerParams(
            dimension_semantics=("parallel",)),
    )(patches, params["patch_w"], posb)

    # ---- stage 2: fused transformer encoder ----
    out = pl.pallas_call(
        partial(encoder_kernel, TB=TB, N=N, E=E, H=H),
        out_shape=jax.ShapeDtypeStruct((B, N, E), jnp.float32),
        grid=(B // TB, depth),
        in_specs=[
            pl.BlockSpec((TB, N, E), lambda b, d: (b, 0, 0)),         # tokens (per tile)
            pl.BlockSpec((1, 4, E), lambda b, d: (d, 0, 0)),          # LN1/LN2 w,b
            pl.BlockSpec((1, E, 3 * E), lambda b, d: (d, 0, 0)),      # qkv weight (bf16)
            pl.BlockSpec((1, E, E), lambda b, d: (d, 0, 0)),          # flat proj weight (bf16)
            pl.BlockSpec((1, 1, E), lambda b, d: (d, 0, 0)),          # proj bias
            pl.BlockSpec((1, E, Hm), lambda b, d: (d, 0, 0)),         # fc1 weight (bf16)
            pl.BlockSpec((1, 1, Hm), lambda b, d: (d, 0, 0)),         # fc1 bias
            pl.BlockSpec((1, Hm, E), lambda b, d: (d, 0, 0)),         # fc2 weight (bf16)
            pl.BlockSpec((1, 1, E), lambda b, d: (d, 0, 0)),          # fc2 bias
            pl.BlockSpec((2, E), lambda b, d: (0, 0)),                # final LN w,b
        ],
        out_specs=pl.BlockSpec((TB, N, E), lambda b, d: (b, 0, 0)),   # resident across depth
        scratch_shapes=[pltpu.VMEM((TB * N, E), jnp.float32)],        # token carry (per tile)
        compiler_params=pltpu.CompilerParams(
            # batch tiles are independent -> "parallel" (v7x megacore);
            # depth carries state in scratch -> "arbitrary".
            dimension_semantics=("parallel", "arbitrary"),
            vmem_limit_bytes=_vmem_limit_bytes(E, Hm, N, H, TB)),
    )(tokens, params["ln"], params["qkv_w"], params["proj_w"], params["proj_b"],
      params["fc1_w"], params["fc1_b"], params["fc2_w"], params["fc2_b"],
      params["final_ln"])
    return out


# ---------------- glue: patches, pos table, params ----------------
def extract_patches(x, p):
    """NCHW image -> (B, num_patches, C*p*p), patch flattened as (C, kh, kw)."""
    B, C, Himg, Wimg = x.shape
    x = x.reshape(B, C, Himg // p, p, Wimg // p, p)
    x = x.transpose(0, 2, 4, 1, 3, 5)                             # (B, Hp, Wp, C, p, p)
    return x.reshape(B, (Himg // p) * (Wimg // p), C * p * p)


def sinusoid_table(n_position, d_hid):
    pos = np.arange(n_position, dtype=np.float64)[:, None]
    i = np.arange(d_hid)[None, :]
    angle = pos / np.power(10000, 2 * (i // 2) / d_hid)
    table = np.zeros((n_position, d_hid), dtype=np.float32)
    table[:, 0::2] = np.sin(angle[:, 0::2])
    table[:, 1::2] = np.cos(angle[:, 1::2])
    return jnp.asarray(table)                                     # (N, E)


def xavier_uniform(key, fan_out, fan_in):
    a = math.sqrt(6.0 / (fan_in + fan_out))
    return jax.random.uniform(key, (fan_out, fan_in), jnp.float32, -a, a)


def init_params(key, cfg):
    E, C, p = cfg["embed_dim"], cfg["in_chans"], cfg["patch_size"]
    Hm, depth, H = cfg["mlp_hidden"], cfg["depth"], cfg["num_heads"]
    hd = E // H
    num_patches = (cfg["img_size"] // p) ** 2
    keys = jax.random.split(key, 1 + depth)

    # PatchEmbed conv (not touched by _init_weights): deterministic normal.
    conv_w = 0.02 * jax.random.normal(keys[0], (E, C, p, p), jnp.float32)
    patch_w = conv_w.reshape(E, C * p * p).T                      # (P, E)
    patch_b = jnp.zeros((E,), jnp.float32)
    pos = sinusoid_table(num_patches, E)
    scale = float(hd) ** -0.5

    ln, qkv_w, proj_w, proj_b = [], [], [], []
    fc1_w, fc1_b, fc2_w, fc2_b = [], [], [], []
    for d in range(depth):
        bk = jax.random.split(keys[1 + d], 4)
        qw = xavier_uniform(bk[0], 3 * E, E).T                    # (E, 3E), qkv_bias=False
        qw = qw.at[:, :E].multiply(scale)                         # fold softmax scale into Q
        pw = xavier_uniform(bk[1], E, E).T                        # (E, E)
        f1 = xavier_uniform(bk[2], Hm, E).T                       # (E, Hm)
        f2 = xavier_uniform(bk[3], E, Hm).T                       # (Hm, E)
        ln.append(jnp.stack([jnp.ones((E,), jnp.float32),
                             jnp.zeros((E,), jnp.float32),
                             jnp.ones((E,), jnp.float32),
                             jnp.zeros((E,), jnp.float32)]))      # (4, E)
        qkv_w.append(qw)
        proj_w.append(pw)
        proj_b.append(jnp.zeros((1, E), jnp.float32))
        fc1_w.append(f1)
        fc1_b.append(jnp.zeros((1, Hm), jnp.float32))
        fc2_w.append(f2)
        fc2_b.append(jnp.zeros((1, E), jnp.float32))

    stack = lambda xs: jnp.stack(xs, axis=0)
    bf = lambda a: a.astype(jnp.bfloat16)                         # weight stacks in bf16
    return {
        "patch_w": bf(patch_w), "patch_b": patch_b, "pos_embed": pos,
        "ln": stack(ln),
        "qkv_w": bf(stack(qkv_w)), "proj_w": bf(stack(proj_w)),
        "proj_b": stack(proj_b),
        "fc1_w": bf(stack(fc1_w)), "fc1_b": stack(fc1_b),
        "fc2_w": bf(stack(fc2_w)), "fc2_b": stack(fc2_b),
        "final_ln": jnp.stack([jnp.ones((E,), jnp.float32),
                               jnp.zeros((E,), jnp.float32)]),    # (2, E)
    }


# ---------------- pure-JAX reference (for a sanity check) ----------------
def reference_forward(x, params, cfg):
    B = x.shape[0]
    psz, E, H = cfg["patch_size"], cfg["embed_dim"], cfg["num_heads"]
    hd = E // H
    f32 = lambda a: a.astype(jnp.float32)
    patches = extract_patches(x, psz)
    _, N, P = patches.shape
    xt = patches.reshape(B * N, P) @ f32(params["patch_w"]) + params["patch_b"]
    xt = xt + jnp.tile(params["pos_embed"], (B, 1))
    depth = params["qkv_w"].shape[0]
    for d in range(depth):
        n1w, n1b, n2w, n2b = params["ln"][d]
        h = _layer_norm(xt, n1w, n1b)
        qkv = h @ f32(params["qkv_w"][d])
        q = qkv[:, :E].reshape(B, N, H, hd).transpose(0, 2, 1, 3)
        k = qkv[:, E:2 * E].reshape(B, N, H, hd).transpose(0, 2, 1, 3)
        v = qkv[:, 2 * E:].reshape(B, N, H, hd).transpose(0, 2, 1, 3)
        s = jnp.einsum("bhqd,bhkd->bhqk", q, k)
        a = jax.nn.softmax(s, axis=-1)
        o = jnp.einsum("bhqk,bhkd->bhqd", a, v)
        o = o.transpose(0, 2, 1, 3).reshape(B * N, E)
        xt = xt + o @ f32(params["proj_w"][d]) + params["proj_b"][d][0]
        h2 = _layer_norm(xt, n2w, n2b)
        m = jax.nn.gelu(h2 @ f32(params["fc1_w"][d]) + params["fc1_b"][d][0],
                        approximate=True)
        xt = xt + m @ f32(params["fc2_w"][d]) + params["fc2_b"][d][0]
    xt = _layer_norm(xt, params["final_ln"][0], params["final_ln"][1])
    return xt.reshape(B, N, E)


if __name__ == "__main__":
    cfg = dict(img_size=16, patch_size=4, in_chans=3, embed_dim=32,
               depth=2, num_heads=4, mlp_hidden=32 * 4, batch_tile=2)
    key = jax.random.PRNGKey(0)
    k_x, k_p = jax.random.split(key)
    B = 4
    x = jax.random.normal(k_x, (B, cfg["in_chans"], cfg["img_size"],
                                cfg["img_size"]), jnp.float32)
    params = init_params(k_p, cfg)

    out = vit_encoder_forward(x, params, cfg)
    jax.block_until_ready(out)

    N = (cfg["img_size"] // cfg["patch_size"]) ** 2
    assert out.shape == (B, N, cfg["embed_dim"])

    ref = reference_forward(x, params, cfg)
    jax.block_until_ready(ref)
    # tolerance covers bf16 weight / activation rounding inside the kernel
    # (reference computes in f32 with the same bf16-stored weights).
    assert bool(jnp.allclose(out, ref, rtol=5e-2, atol=5e-2)), \
        "Pallas output does not match JAX reference"

    print("KERNEL_OK")
</pallas_src>

<mosaic_0001>
module attributes {stable_mosaic.version = 11 : i64} {
  func.func @patch_embed_kernel(%arg0: i32, %arg1: memref<1x16x48xf32, #tpu.memory_space<vmem>>, %arg2: memref<48x32xbf16, #tpu.memory_space<vmem>>, %arg3: memref<16x32xf32, #tpu.memory_space<vmem>>, %arg4: memref<1x16x32xf32, #tpu.memory_space<vmem>>) attributes {dimension_semantics = [#tpu.dimension_semantics<parallel>], iteration_bounds = array<i64: 4>, scalar_prefetch = 0 : i64, scratch_operands = 0 : i64, tpu.core_type = #tpu.core_type<tc>, window_params = [{transform_indices = @transform_0, window_bounds = array<i64: 1, 16, 48>}, {pipeline_mode = #tpu.pipeline_mode<synchronous>, transform_indices = @transform_1, window_bounds = array<i64: 48, 32>}, {pipeline_mode = #tpu.pipeline_mode<synchronous>, transform_indices = @transform_2, window_bounds = array<i64: 16, 32>}, {transform_indices = @transform_3, window_bounds = array<i64: 1, 16, 32>}]} {
    %c0 = arith.constant 0 : index
    %c0_0 = arith.constant 0 : index
    %c0_1 = arith.constant 0 : index
    %0 = vector.load %arg1[%c0, %c0_0, %c0_1] : memref<1x16x48xf32, #tpu.memory_space<vmem>>, vector<1x16x48xf32>
    %1 = vector.shape_cast %0 : vector<1x16x48xf32> to vector<16x48xf32>
    %2 = arith.truncf %1 : vector<16x48xf32> to vector<16x48xbf16>
    %c0_2 = arith.constant 0 : index
    %c0_3 = arith.constant 0 : index
    %3 = vector.load %arg2[%c0_2, %c0_3] : memref<48x32xbf16, #tpu.memory_space<vmem>>, vector<48x32xbf16>
    %cst = arith.constant dense<0.000000e+00> : vector<16x32xf32>
    %4 = tpu.matmul %2, %3, %cst {dimension_numbers = #tpu.dot_dimension_numbers<[1], [0], [0], [1], [0, 0, 1, 1], [], []>} : vector<16x48xbf16>, vector<48x32xbf16>, vector<16x32xf32> -> vector<16x32xf32>
    %c0_4 = arith.constant 0 : index
    %c0_5 = arith.constant 0 : index
    %5 = vector.load %arg3[%c0_4, %c0_5] : memref<16x32xf32, #tpu.memory_space<vmem>>, vector<16x32xf32>
    %6 = arith.addf %4, %5 : vector<16x32xf32>
    %c0_6 = arith.constant 0 : index
    %c0_7 = arith.constant 0 : index
    %c0_8 = arith.constant 0 : index
    %7 = vector.load %arg4[%c0_6, %c0_7, %c0_8] : memref<1x16x32xf32, #tpu.memory_space<vmem>>, vector<1x16x32xf32>
    %8 = vector.shape_cast %7 : vector<1x16x32xf32> to vector<16x32xf32>
    %9 = vector.shape_cast %6 : vector<16x32xf32> to vector<1x16x32xf32>
    tpu.vector_store %arg4[%c0_6, %c0_7, %c0_8], %9 {strides = array<i32>} : memref<1x16x32xf32, #tpu.memory_space<vmem>>, vector<1x16x32xf32>,
    return
  }
  func.func @transform_0(%arg0: i32) -> (i32, i32, i32) {
    %c0_i32 = arith.constant 0 : i32
    %c0_i32_0 = arith.constant 0 : i32
    %c0_i32_1 = arith.constant 0 : i32
    return %arg0, %c0_i32, %c0_i32_0 : i32, i32, i32
  }
  func.func @transform_1(%arg0: i32) -> (i32, i32) {
    %c0_i32 = arith.constant 0 : i32
    %c0_i32_0 = arith.constant 0 : i32
    %c0_i32_1 = arith.constant 0 : i32
    return %c0_i32, %c0_i32_0 : i32, i32
  }
  func.func @transform_2(%arg0: i32) -> (i32, i32) {
    %c0_i32 = arith.constant 0 : i32
    %c0_i32_0 = arith.constant 0 : i32
    %c0_i32_1 = arith.constant 0 : i32
    return %c0_i32, %c0_i32_0 : i32, i32
  }
  func.func @transform_3(%arg0: i32) -> (i32, i32, i32) {
    %c0_i32 = arith.constant 0 : i32
    %c0_i32_0 = arith.constant 0 : i32
    %c0_i32_1 = arith.constant 0 : i32
    return %arg0, %c0_i32, %c0_i32_0 : i32, i32, i32
  }
}

</mosaic_0001>

<bundles_post_ra>
// kernel: tpu_custom_call.1
= control target key start
LH: loop header
LB: loop body
LE: loop exit
PB: predicated region body
PF: predicated region fallthrough
CT: control target
= control target key end

     0   :  { %8 = vsyncpa [#allocation3], 0  ;;  %s732_s0 = inlined_call_operand.hbm [shape: f32[4,16,48], index: 0, kind: input, shape index: {}]   ;;  %s733_s1 = inlined_call_operand.vmem [shape: bf16[48,32], index: 1, kind: input, shape index: {}]   ;;  %s734_s2 = inlined_call_operand.vmem [shape: f32[16,32], index: 2, kind: input, shape index: {}]   ;;  %s735_s3 = inlined_call_operand.hbm [shape: f32[4,16,32], index: 3, kind: output, shape index: {}]  }
   0x1   :  { %10 = vsyncpa [#allocation3 + $0x1], 0 }
   0x2   :  { %11 = vsyncpa [#allocation4], 0 }
   0x3   :  { %13 = vsyncpa [#allocation4 + $0x1], 0  ;;  %s565_s12 = smov 0   ;;  %s567_s13 = smov 0  }
   0x4   :  { %s569_s14 = smov 0   ;;  %s571_s15 = smov 0  }
   0x5 LB: > { %s586_s16 = sadd.s32 4294967295, %s535_s15   ;;  %s354_s17 = sadd.s32 4294967294, %s535_s15   ;;  %s535_s15 = sphi %s571_s15, %s749_s15   ;;  %s531_s14 = sphi %s569_s14, %s748_s14   ;;  %s527_s13 = sphi %s567_s13, %s747_s13   ;;  %s523_s12 = sphi %s565_s12, %s746_s12  }
   0x6   : > { %s590_s18 = sadd.s32 1, %s535_s15   ;;  %s26_s19 = sadd.s32 1, %s531_s14 }
   0x7   : > { %s23_s20 = ssub.s32 %s535_s15, %s590_s18  ;;  %p33_p0 = scmp.ne.s32.totalorder %s531_s14, %s527_s13 }
   0x8   : > { %p24_p1 = scmp.eq.s32.totalorder %s23_s20, 0  ;;  %p34_p2 = scmp.eq.s32.totalorder %s535_s15, 0 }
   0x9   : > { %p39_p3 = scmp.ne.s32.totalorder %s527_s13, %s523_s12  ;;  %p40_p4 = scmp.eq.s32.totalorder %s586_s16, 0 }
   0xa   : > { %s602_s21 = scalar_select %p24_p1, %s531_s14, %s26_s19  }
   0xb   : > { %p604_p5 = por %p34_p2, %p33_p0  ;;  %p608_p6 = por %p40_p4, %p39_p3 }
   0xc   : > { %p105_p7 = scmp.eq.s32.totalorder %s586_s16, 3  ;;  %p111_p8 = scmp.eq.s32.totalorder %s354_s17, 3 }
   0xd   : > { %s739_s23 = scalar_select %p608_p6, 1, 0 }
   0xe   : > { %p400_p9 = scmp.lt.s32.totalorder %s535_s15, 4  ;;  %p614_p10 = por %p105_p7, %p33_p0 }
   0xf   : > { %p618_p11 = por %p111_p8, %p39_p3  ;;  %s137_s26 = sand.u32 1, %s531_s14  }
  0x10   : > { %s740_s24 = scalar_select %p614_p10, 1, 0 }
  0x11   : > { %s741_s25 = scalar_select %p618_p11, 1, 0 }
  0x12   : > { %s372_s27 = sshll.u32 %s535_s15, 8  ;;  %s357_s28 = sshll.u32 %s137_s26, 4 }
  0x13   : > { %s627_s4 = scalar_lea.hbm %s732_s0, %s372_s27  ;;  %s141_s5 = scalar_lea.vmem [#allocation2], %s357_s28 }
  0x14   : > { %s148_s6 = sshll.u32 %s141_s5, 4  ;;  %p631_p12 = pnand %p400_p9, %p604_p5  ;;  %s635_s6 = int_to_ptr.vmem [resolvable:$true] %s148_s6 }
  0x15   : > { %s637_s8 = scalar_lea.sflag [#allocation3], %s137_s26  ;;  %s443_s9 = scalar_lea.hbm %s627_s4, 256 }
  0x16   : > { %p444_p13 = scmp.ne.s32.totalorder %s627_s4, %s443_s9  ;;  %p445_p0 = pneg %p631_p12 }
  0x17   : > { %s448_s17 = scalar_lea.hbm %s732_s0, 1024  ;;  %p449_p3 = scmp.lt.s32.totalorder %s627_s4, %s732_s0 }
  0x18   : > { %p446_p1 = pnand %p445_p0, %p444_p13  ;;  %p450_p4 = scmp.lt.s32.totalorder %s448_s17, %s443_s9 }
  0x1a   : > { %p447_p2 = pneg %p446_p1  ;;  %p451_p5 = por %p450_p4, %p449_p3 }
  0x1c   : > { %p452_p7 = pnand %p451_p5, %p447_p2 }
  0x1e   : > { %455 = shalt.err (!%p452_p7)
}
  0x1f   : > { %s456_s22 = scalar_lea.vmem %s635_s6, 256  ;;  %s537_s26 = smov [#allocation2]  }
  0x20   : > { %p457_p8 = scmp.ne.s32.totalorder %s635_s6, %s456_s22  ;;  %s461_s27 = sshll.u32 %s537_s26, 4  ;;  %s462_s27 = int_to_ptr.vmem [resolvable:$false] %s461_s27 }
  0x21   : > { %s463_s28 = scalar_lea.vmem %s462_s27, 512  ;;  %p464_p1 = scmp.lt.s32.totalorder %s635_s6, %s462_s27 }
  0x22   : > { %p459_p9 = pnand %p457_p8, %p445_p0  ;;  %p465_p11 = scmp.lt.s32.totalorder %s463_s28, %s456_s22 }
  0x24   : > { %p460_p13 = pneg %p459_p9  ;;  %p466_p10 = por %p465_p11, %p464_p1 }
  0x26   : > { %p467_p6 = pnand %p466_p10, %p460_p13 }
  0x28   : > { %470 = shalt.err (!%p467_p6)
}
  0x29   : > { %s538_s29 = smov 128   ;;  %s539_s30 = smov 8  }
  0x2a   : > { %395 = dma.hbm_to_vmem [thread:$0]  (!%p631_p12), %s627_s4, 256, %s635_s6, %s637_s8, %s538_s29, %s538_s29, %s539_s30  }
  0x2b   : > { %p360_p0 = scmp.ge.s32.totalorder %s535_s15, 1  ;;  %p156_p2 = scmp.lt.s32.totalorder %s535_s15, 5 }
  0x2d   : > { %p157_p3 = pnand %p360_p0, %p156_p2 }
  0x2e   : > { %s661_s5 = sand.u32 (!%p157_p3), 1, %s527_s13   ;;  %p743_p6 = scmp.ne.s32.totalorder (!%p157_p3), %s739_s23, 0 }
  0x2f   : > { %160 = sbr.rel (%p157_p3) target bundleno = 279 (0x117), region = 32  ;;  %s361_s9 = sshll.u32 (!%p157_p3), %s661_s5, 4 }
  0x30   : > { %s163_s10 = scalar_lea.sflag (!%p157_p3), [#allocation3], %s661_s5  ;;  %s166_s11 = scalar_lea.vmem (!%p157_p3), [#allocation2], %s361_s9 }
  0x34   : > { %514 = dma.done.wait (%p743_p6), %s163_s10, 256  }
  0x35   : > { %516 = vsyncadd (%p743_p6), %s163_s10, 4294967040  ;;  %v540_v0 = vmov 0.0   ;;  %vm541_vm0 = vmmov 0   ;;  %v440_v1 = vld [vmem:[%s733_s1 + $0x10] sm:$0xff]   ;;  %v441_v2 = vld [vmem:[%s733_s1 + $0x8] sm:$0xff]   ;;  %vm219_vm1 = vcmask 392192  }
  0x36   : > { %378 = vmatprep.subr.bf16.mxu0 %v540_v0  ;;  %384 = vmatprep.mubr.msk.bf16.mxu0 %vm541_vm0, %v540_v0  ;;  %v442_v3 = vld [vmem:[%s733_s1] sm:$0xff]   ;;  %v191_v5 = vld [vmem:[%s166_s11 + $0x8] sm:$0xff]  ;;  %vm264_vm2 = vcmask 261120   ;;  %s188_s22 = scalar_lea.vmem [#allocation5], %s361_s9  ;;  %s373_s27 = sshll.u32 %s586_s16, 8 }
  0x37   : > { %379 = vmatpush3.bf16.msra.mxu0 %v440_v1  ;;  %v190_v4 = vld [vmem:[%s166_s11] sm:$0xff]  ;;  %s281_s26 = sshll.u32 %s188_s22, 4  ;;  %v200_v11 = vld [vmem:[%s734_s2 + $0x8] sm:$0xff]  ;;  %s690_s9 = scalar_lea.hbm %s735_s3, %s373_s27  ;;  %s685_s26 = int_to_ptr.vmem [resolvable:$true] %s281_s26 }
  0x38   : > { %380 = vmatprep.subr.bf16.mxu0 %v540_v0  ;;  %v192_v6 = vpack.c.bf16 %v191_v5, %v190_v4  ;;  %v199_v7 = vld [vmem:[%s734_s2] sm:$0xff]  ;;  %s268_s16 = scalar_lea.sflag [#allocation4], %s661_s5  ;;  %s471_s11 = scalar_lea.vmem %s685_s26, 256 }
  0x39   : > { %p472_p10 = scmp.ne.s32.totalorder %s685_s26, %s471_s11  ;;  %p744_p11 = scmp.ne.s32.totalorder %s740_s24, 0 }
  0x3a   : > { %s542_s4 = smov [#allocation5]  }
  0x3b   : > { %381 = vmatpush3.bf16.msra.mxu0 %v441_v2  ;;  %p473_p12 = pnand %p472_p10, %p744_p11  ;;  %s475_s6 = sshll.u32 %s542_s4, 4  ;;  %s476_s6 = int_to_ptr.vmem [resolvable:$false] %s475_s6 }
  0x3c   : > { %382 = vmatprep.subr.bf16.mxu0 %v540_v0  ;;  %s477_s7 = scalar_lea.vmem %s476_s6, 512  ;;  %p478_p5 = scmp.lt.s32.totalorder %s685_s26, %s476_s6 }
  0x3d   : > { %p474_p4 = pneg %p473_p12  ;;  %p479_p7 = scmp.lt.s32.totalorder %s477_s7, %s471_s11 }
  0x3f   : > { %383 = vmatpush3.bf16.msra.mxu0 %v442_v3  ;;  %p480_p8 = por %p479_p7, %p478_p5 }
  0x41   : > { %p481_p9 = pnand %p480_p8, %p474_p4 }
  0x42   : > { %385 = vmatmul.mubr.msk.bf16.vlgmr.msra.gmra.mxu0 %vm219_vm1, %v192_v6 }
 0x102   : > { %v257_v8 = vpop.f32.mrf.mxu0 }
 0x103   : > { %v258_v9 = vadd.f32 %v257_v8, %v199_v7 }
 0x104   : > { %v386_v10 = vpop.f32.mrf.mxu0 }
 0x105   : > { %265 = vst.msk [vmem:[%s188_s22] sm:$0xff] %vm264_vm2, %v258_v9 }
 0x106   : > { %v260_v12 = vpop.f32.mrf.mxu0 }
 0x107   : > { %v261_v13 = vadd.f32 %v260_v12, %v200_v11 }
 0x108   : > { %v387_v14 = vpop.f32.mrf.mxu0 }
 0x109   : > { %266 = vst.msk [vmem:[%s188_s22 + $0x8] sm:$0xff] %vm264_vm2, %v261_v13 }
 0x10a   : > { %484 = shalt.err (!%p481_p9)
}
 0x10b   : > { %s485_s8 = scalar_lea.hbm %s690_s9, 256  ;;  %s489_s23 = scalar_lea.hbm %s735_s3, 1024 }
 0x10c   : > { %p486_p13 = scmp.ne.s32.totalorder %s690_s9, %s485_s8  ;;  %p490_p2 = scmp.lt.s32.totalorder %s690_s9, %s735_s3 }
 0x10d   : > { %p491_p3 = scmp.lt.s32.totalorder %s489_s23, %s485_s8 }
 0x10e   : > { %p487_p1 = pnand %p486_p13, %p744_p11 }
 0x10f   : > { %p492_p6 = por %p491_p3, %p490_p2 }
 0x110   : > { %p488_p0 = pneg %p487_p1 }
 0x112   : > { %p493_p10 = pnand %p492_p6, %p488_p0 }
 0x114   : > { %496 = shalt.err (!%p493_p10)
}
 0x115   : > { %s543_s27 = smov 128   ;;  %s544_s28 = smov 8  }
 0x116   : > { %390 = dma.vmem_to_hbm [thread:$0]  (%p744_p11), %s685_s26, 256, %s690_s9, %s268_s16, %s543_s27, %s543_s27, %s544_s28  }
 0x117 PF: > { %p401_p12 = scmp.ge.s32.totalorder %s535_s15, 2  ;;  %s296_s29 = sand.u32 1, %s523_s12  }
 0x118   : > { %p745_p4 = scmp.ne.s32.totalorder %s741_s25, 0  ;;  %s297_s30 = scalar_lea.sflag [#allocation4], %s296_s29 }
 0x11a   : > { %p397_p5 = pnand %p401_p12, %p745_p4 }
 0x11c   : > { %p398_p7 = pneg %p397_p5 }
 0x11e   : > { %518 = dma.done.wait (%p398_p7), %s297_s30, 256  }
 0x11f   : > { %520 = vsyncadd (%p398_p7), %s297_s30, 4294967040  ;;  %p16_p8 = scmp.ge.s32.totalorder %s590_s18, 6   ;;  %s746_s12 = smov %s527_s13 }
 0x120   : > { %s747_s13 = smov %s531_s14  ;;  %s748_s14 = smov %s602_s21 }
 0x121   : > { %s749_s15 = smov %s590_s18  ;;  %18 = sbr.rel (!%p16_p8) target bundleno = 5 (0x5), region = 77 }
 0x126   :  { %302 = vsyncpa [#allocation3], 1 }
 0x127   :  { %304 = vsyncpa [#allocation3 + $0x1], 1 }
 0x128   :  { %305 = vsyncpa [#allocation4], 1 }
 0x129   :  { %307 = vsyncpa [#allocation4 + $0x1], 1 }

</bundles_post_ra>
